<compile_context>
chip_gen: v7x
topology: tpu7x:2x2x1
jax: 0.10.0
libtpu: 0.0.40
codegen_flags: <defaults>
</compile_context>

<pallas_src>
import jax
import jax.numpy as jnp
from jax.experimental import pallas as pl
from jax.experimental.pallas import tpu as pltpu

IN_F = 48 * 4 * 4    # 768
H = 100              # true hidden width (fc1/fc2 out features)
OUT_F = 10           # true number of classes
H_PAD = 128          # lane-padded hidden width
OUT_PAD = 128        # lane-padded output width
BN_EPS = 1e-5


def _round_up(n, m):
    return (n + m - 1) // m * m


def _netc_kernel(x_ref, w1_ref, b1_ref, w2_ref, b2_ref, w3_ref, b3_ref, o_ref):
    # x: (TB, 768) input dtype; wN: bf16 (in, out) with BN folded in; bN: f32 (1, out).
    # Cast to bf16 in-kernel (no separate HBM cast pass in the wrapper).
    x = x_ref[...].astype(jnp.bfloat16)

    # fc1 (+ folded bn1) + relu  -- bf16 MXU matmul, f32 accumulation.
    h = jnp.dot(x, w1_ref[...], preferred_element_type=jnp.float32)   # (TB, 128)
    h = jnp.maximum(h + b1_ref[...], 0.0)

    # fc2 (+ folded bn2) + relu
    h = jnp.dot(h.astype(jnp.bfloat16), w2_ref[...],
                preferred_element_type=jnp.float32)                    # (TB, 128)
    h = jnp.maximum(h + b2_ref[...], 0.0)

    # fc3 (output padded to 128 lanes; columns 10..127 are exact zeros)
    o = jnp.dot(h.astype(jnp.bfloat16), w3_ref[...],
                preferred_element_type=jnp.float32)                    # (TB, 128)
    # Bias add in f32, cast only at the store (bf16 writeback halves out traffic).
    o_ref[...] = (o + b3_ref[...]).astype(o_ref.dtype)


def _choose_tile(B, tile_b):
    """Batch tile: big (amortize per-step overhead), clamped for small B, and
    split so large batches give >= 2 grid steps (both v7x TensorCores used)."""
    tb = min(tile_b, B)
    if B > 512 and pl.cdiv(B, tb) < 2:
        tb = (B + 1) // 2
    return max(_round_up(tb, 8), 8)


def netc_forward(x, kp, *, tile_b=1024):
    """x: (B, 768) float (f32 or bf16).  kp: dict from prepare_kernel_params().
    Returns (B, 10) f32."""
    B = x.shape[0]
    tb = _choose_tile(B, tile_b)
    grid = (pl.cdiv(B, tb),)   # ragged last tile; no batch zero-padding pass

    def whole(op):
        nd = op.ndim
        return pl.BlockSpec(op.shape, lambda i, _nd=nd: (0,) * _nd)

    operands = (x, kp["w1"], kp["b1"], kp["w2"], kp["b2"], kp["w3"], kp["b3"])
    in_specs = [pl.BlockSpec((tb, IN_F), lambda i: (i, 0))] + \
               [whole(op) for op in operands[1:]]

    out = pl.pallas_call(
        _netc_kernel,
        out_shape=jax.ShapeDtypeStruct((B, OUT_PAD), jnp.bfloat16),
        grid_spec=pltpu.PrefetchScalarGridSpec(
            num_scalar_prefetch=0,
            grid=grid,
            in_specs=in_specs,
            out_specs=pl.BlockSpec((tb, OUT_PAD), lambda i: (i, 0)),
        ),
        compiler_params=pltpu.CompilerParams(
            dimension_semantics=("parallel",)),
    )(*operands)

    # Tiny (B,10) slice; cast back to f32 to match the PyTorch module's output dtype.
    return out[:, :OUT_F].astype(jnp.float32)


def make_torch_like_params(key):
    """Deterministic synthetic parameters in PyTorch layout (Linear: (out, in))."""
    ks = jax.random.split(key, 8)
    p = {
        "w1": jax.random.normal(ks[0], (H, IN_F), jnp.float32) * 0.02,
        "b1": jax.random.normal(ks[1], (H,), jnp.float32) * 0.02,
        "w2": jax.random.normal(ks[2], (H, H), jnp.float32) * 0.02,
        "b2": jax.random.normal(ks[3], (H,), jnp.float32) * 0.02,
        "w3": jax.random.normal(ks[4], (OUT_F, H), jnp.float32) * 0.02,
        "b3": jax.random.normal(ks[5], (OUT_F,), jnp.float32) * 0.02,
    }

    def bn(key, n):
        k1, k2, k3, k4 = jax.random.split(key, 4)
        return {
            "gamma": 1.0 + 0.1 * jax.random.normal(k1, (n,), jnp.float32),
            "beta": 0.1 * jax.random.normal(k2, (n,), jnp.float32),
            "mean": 0.1 * jax.random.normal(k3, (n,), jnp.float32),
            "var": jnp.abs(jax.random.normal(k4, (n,), jnp.float32)) + 0.5,
        }

    p["bn1"] = bn(ks[6], H)
    p["bn2"] = bn(ks[7], H)
    return p


def prepare_kernel_params(p):
    """Fold eval-mode BN into the Linear weights/biases, pad to 128 lanes,
    transpose to (in, out) layout, and cast matmul operands to bf16."""
    def fold(w_pt, b, bn):
        s = bn["gamma"] / jnp.sqrt(bn["var"] + BN_EPS)      # (out,)
        t = bn["beta"] - bn["mean"] * s
        return w_pt * s[:, None], b * s + t                 # scale per output row

    w1f, b1f = fold(p["w1"], p["b1"], p["bn1"])
    w2f, b2f = fold(p["w2"], p["b2"], p["bn2"])
    w3f, b3f = p["w3"], p["b3"]                             # forward never applies bn_fc3

    def pad_wt(w_pt, in_pad, out_pad):
        # (out, in) torch layout -> zero-padded (in_pad, out_pad) kernel layout, bf16.
        out_f, in_f = w_pt.shape
        w = jnp.zeros((in_pad, out_pad), jnp.float32)
        w = w.at[:in_f, :out_f].set(w_pt.T)
        return w.astype(jnp.bfloat16)

    def pad_b(b, out_pad):
        bb = jnp.zeros((1, out_pad), jnp.float32)
        return bb.at[0, : b.shape[0]].set(b)

    return {
        "w1": pad_wt(w1f, IN_F, H_PAD),
        "b1": pad_b(b1f, H_PAD),
        "w2": pad_wt(w2f, H_PAD, H_PAD),
        "b2": pad_b(b2f, H_PAD),
        "w3": pad_wt(w3f, H_PAD, OUT_PAD),
        "b3": pad_b(b3f, OUT_PAD),
    }


def netc_reference(x, p):
    """Pure-JAX f32 reference of the eval-mode PyTorch forward (unfolded params)."""
    def bn(h, q):
        return q["gamma"] * (h - q["mean"]) / jnp.sqrt(q["var"] + BN_EPS) + q["beta"]

    h = jnp.maximum(bn(x @ p["w1"].T + p["b1"], p["bn1"]), 0.0)
    h = jnp.maximum(bn(h @ p["w2"].T + p["b2"], p["bn2"]), 0.0)
    return h @ p["w3"].T + p["b3"]


if __name__ == "__main__":
    key = jax.random.PRNGKey(0)
    kx, kp = jax.random.split(key)

    B = 8
    x = jax.random.normal(kx, (B, IN_F), jnp.float32)

    tparams = make_torch_like_params(kp)
    kparams = prepare_kernel_params(tparams)

    out = netc_forward(x, kparams)
    out = jax.block_until_ready(out)

    ref = netc_reference(x, tparams)
    assert out.shape == (B, OUT_F)
    max_err = float(jnp.max(jnp.abs(out - ref)))
    assert max_err < 3e-2, f"mismatch vs JAX reference: max abs err {max_err}"

    print("KERNEL_OK")
</pallas_src>

<mosaic_0001>
module attributes {stable_mosaic.version = 11 : i64} {
  func.func @_netc_kernel(%arg0: i32, %arg1: memref<8x768xf32, #tpu.memory_space<vmem>>, %arg2: memref<768x128xbf16, #tpu.memory_space<vmem>>, %arg3: memref<1x128xf32, #tpu.memory_space<vmem>>, %arg4: memref<128x128xbf16, #tpu.memory_space<vmem>>, %arg5: memref<1x128xf32, #tpu.memory_space<vmem>>, %arg6: memref<128x128xbf16, #tpu.memory_space<vmem>>, %arg7: memref<1x128xf32, #tpu.memory_space<vmem>>, %arg8: memref<8x128xbf16, #tpu.memory_space<vmem>>) attributes {dimension_semantics = [#tpu.dimension_semantics<parallel>], iteration_bounds = array<i64: 1>, scalar_prefetch = 0 : i64, scratch_operands = 0 : i64, tpu.core_type = #tpu.core_type<tc>, window_params = [{transform_indices = @transform_0, window_bounds = array<i64: 8, 768>}, {pipeline_mode = #tpu.pipeline_mode<synchronous>, transform_indices = @transform_1, window_bounds = array<i64: 768, 128>}, {pipeline_mode = #tpu.pipeline_mode<synchronous>, transform_indices = @transform_2, window_bounds = array<i64: 1, 128>}, {pipeline_mode = #tpu.pipeline_mode<synchronous>, transform_indices = @transform_3, window_bounds = array<i64: 128, 128>}, {pipeline_mode = #tpu.pipeline_mode<synchronous>, transform_indices = @transform_4, window_bounds = array<i64: 1, 128>}, {pipeline_mode = #tpu.pipeline_mode<synchronous>, transform_indices = @transform_5, window_bounds = array<i64: 128, 128>}, {pipeline_mode = #tpu.pipeline_mode<synchronous>, transform_indices = @transform_6, window_bounds = array<i64: 1, 128>}, {transform_indices = @transform_7, window_bounds = array<i64: 8, 128>}]} {
    %c0 = arith.constant 0 : index
    %c0_0 = arith.constant 0 : index
    %0 = vector.load %arg1[%c0, %c0_0] : memref<8x768xf32, #tpu.memory_space<vmem>>, vector<8x768xf32>
    %1 = arith.truncf %0 : vector<8x768xf32> to vector<8x768xbf16>
    %c0_1 = arith.constant 0 : index
    %c0_2 = arith.constant 0 : index
    %2 = vector.load %arg2[%c0_1, %c0_2] : memref<768x128xbf16, #tpu.memory_space<vmem>>, vector<768x128xbf16>
    %cst = arith.constant dense<0.000000e+00> : vector<8x128xf32>
    %3 = tpu.matmul %1, %2, %cst {dimension_numbers = #tpu.dot_dimension_numbers<[1], [0], [0], [1], [0, 0, 1, 1], [], []>} : vector<8x768xbf16>, vector<768x128xbf16>, vector<8x128xf32> -> vector<8x128xf32>
    %c0_3 = arith.constant 0 : index
    %c0_4 = arith.constant 0 : index
    %4 = vector.load %arg3[%c0_3, %c0_4] : memref<1x128xf32, #tpu.memory_space<vmem>>, vector<1x128xf32>
    %5 = vector.broadcast %4 : vector<1x128xf32> to vector<8x128xf32>
    %6 = arith.addf %3, %5 : vector<8x128xf32>
    %cst_5 = arith.constant 0.000000e+00 : f32
    %7 = vector.broadcast %cst_5 : f32 to vector<8x128xf32>
    %8 = arith.maximumf %6, %7 : vector<8x128xf32>
    %9 = arith.truncf %8 : vector<8x128xf32> to vector<8x128xbf16>
    %c0_6 = arith.constant 0 : index
    %c0_7 = arith.constant 0 : index
    %10 = vector.load %arg4[%c0_6, %c0_7] : memref<128x128xbf16, #tpu.memory_space<vmem>>, vector<128x128xbf16>
    %cst_8 = arith.constant dense<0.000000e+00> : vector<8x128xf32>
    %11 = tpu.matmul %9, %10, %cst_8 {dimension_numbers = #tpu.dot_dimension_numbers<[1], [0], [0], [1], [0, 0, 1, 1], [], []>} : vector<8x128xbf16>, vector<128x128xbf16>, vector<8x128xf32> -> vector<8x128xf32>
    %c0_9 = arith.constant 0 : index
    %c0_10 = arith.constant 0 : index
    %12 = vector.load %arg5[%c0_9, %c0_10] : memref<1x128xf32, #tpu.memory_space<vmem>>, vector<1x128xf32>
    %13 = vector.broadcast %12 : vector<1x128xf32> to vector<8x128xf32>
    %14 = arith.addf %11, %13 : vector<8x128xf32>
    %cst_11 = arith.constant 0.000000e+00 : f32
    %15 = vector.broadcast %cst_11 : f32 to vector<8x128xf32>
    %16 = arith.maximumf %14, %15 : vector<8x128xf32>
    %17 = arith.truncf %16 : vector<8x128xf32> to vector<8x128xbf16>
    %c0_12 = arith.constant 0 : index
    %c0_13 = arith.constant 0 : index
    %18 = vector.load %arg6[%c0_12, %c0_13] : memref<128x128xbf16, #tpu.memory_space<vmem>>, vector<128x128xbf16>
    %cst_14 = arith.constant dense<0.000000e+00> : vector<8x128xf32>
    %19 = tpu.matmul %17, %18, %cst_14 {dimension_numbers = #tpu.dot_dimension_numbers<[1], [0], [0], [1], [0, 0, 1, 1], [], []>} : vector<8x128xbf16>, vector<128x128xbf16>, vector<8x128xf32> -> vector<8x128xf32>
    %c0_15 = arith.constant 0 : index
    %c0_16 = arith.constant 0 : index
    %20 = vector.load %arg7[%c0_15, %c0_16] : memref<1x128xf32, #tpu.memory_space<vmem>>, vector<1x128xf32>
    %21 = vector.broadcast %20 : vector<1x128xf32> to vector<8x128xf32>
    %22 = arith.addf %19, %21 : vector<8x128xf32>
    %23 = arith.truncf %22 : vector<8x128xf32> to vector<8x128xbf16>
    %c0_17 = arith.constant 0 : index
    %c0_18 = arith.constant 0 : index
    %24 = vector.load %arg8[%c0_17, %c0_18] : memref<8x128xbf16, #tpu.memory_space<vmem>>, vector<8x128xbf16>
    tpu.vector_store %arg8[%c0_17, %c0_18], %23 {strides = array<i32>} : memref<8x128xbf16, #tpu.memory_space<vmem>>, vector<8x128xbf16>,
    return
  }
  func.func @transform_0(%arg0: i32) -> (i32, i32) {
    %c0_i32 = arith.constant 0 : i32
    %c0_i32_0 = arith.constant 0 : i32
    return %arg0, %c0_i32 : i32, i32
  }
  func.func @transform_1(%arg0: i32) -> (i32, i32) {
    %c0_i32 = arith.constant 0 : i32
    %c0_i32_0 = arith.constant 0 : i32
    %c0_i32_1 = arith.constant 0 : i32
    return %c0_i32, %c0_i32_0 : i32, i32
  }
  func.func @transform_2(%arg0: i32) -> (i32, i32) {
    %c0_i32 = arith.constant 0 : i32
    %c0_i32_0 = arith.constant 0 : i32
    %c0_i32_1 = arith.constant 0 : i32
    return %c0_i32, %c0_i32_0 : i32, i32
  }
  func.func @transform_3(%arg0: i32) -> (i32, i32) {
    %c0_i32 = arith.constant 0 : i32
    %c0_i32_0 = arith.constant 0 : i32
    %c0_i32_1 = arith.constant 0 : i32
    return %c0_i32, %c0_i32_0 : i32, i32
  }
  func.func @transform_4(%arg0: i32) -> (i32, i32) {
    %c0_i32 = arith.constant 0 : i32
    %c0_i32_0 = arith.constant 0 : i32
    %c0_i32_1 = arith.constant 0 : i32
    return %c0_i32, %c0_i32_0 : i32, i32
  }
  func.func @transform_5(%arg0: i32) -> (i32, i32) {
    %c0_i32 = arith.constant 0 : i32
    %c0_i32_0 = arith.constant 0 : i32
    %c0_i32_1 = arith.constant 0 : i32
    return %c0_i32, %c0_i32_0 : i32, i32
  }
  func.func @transform_6(%arg0: i32) -> (i32, i32) {
    %c0_i32 = arith.constant 0 : i32
    %c0_i32_0 = arith.constant 0 : i32
    %c0_i32_1 = arith.constant 0 : i32
    return %c0_i32, %c0_i32_0 : i32, i32
  }
  func.func @transform_7(%arg0: i32) -> (i32, i32) {
    %c0_i32 = arith.constant 0 : i32
    %c0_i32_0 = arith.constant 0 : i32
    return %arg0, %c0_i32 : i32, i32
  }
}

</mosaic_0001>

<bundles_post_ra>
// kernel: tpu_custom_call.1
= control target key start
LH: loop header
LB: loop body
LE: loop exit
PB: predicated region body
PF: predicated region fallthrough
CT: control target
= control target key end

     0   :  { %12 = vsyncpa [#allocation3], 0  ;;  %s1376_s0 = inlined_call_operand.hbm [shape: f32[8,768], index: 0, kind: input, shape index: {}]   ;;  %s1377_s1 = inlined_call_operand.hbm [shape: bf16[768,128], index: 1, kind: input, shape index: {}]   ;;  %s1378_s2 = inlined_call_operand.vmem [shape: f32[1,128], index: 2, kind: input, shape index: {}]   ;;  %s1379_s3 = inlined_call_operand.hbm [shape: bf16[128,128], index: 3, kind: input, shape index: {}]   ;;  %s1380_s4 = inlined_call_operand.vmem [shape: f32[1,128], index: 4, kind: input, shape index: {}]   ;;  %s1381_s5 = inlined_call_operand.hbm [shape: bf16[128,128], index: 5, kind: input, shape index: {}]   ;;  %s1382_s6 = inlined_call_operand.vmem [shape: f32[1,128], index: 6, kind: input, shape index: {}]   ;;  %s1383_s7 = inlined_call_operand.hbm [shape: bf16[8,128], index: 7, kind: output, shape index: {}]  }
   0x1   :  { %13 = vsyncpa [#allocation6], 0 }
   0x2   :  { %14 = vsyncpa [#allocation9], 0 }
   0x3   :  { %15 = vsyncpa [#allocation4], 0  ;;  %s1231_s24 = smov [#allocation5]   ;;  %s1113_s28 = scalar_lea.hbm %s1377_s1, 6144 }
   0x4   :  { %s31_s25 = sshll.u32 %s1231_s24, 4  ;;  %p1114_p0 = scmp.ne.s32.totalorder %s1377_s1, %s1113_s28  ;;  %s32_s25 = int_to_ptr.vmem [resolvable:$true] %s31_s25 }
   0x5   :  { %p1117_p1 = scmp.lt.u32.totalorder %s1113_s28, %s1377_s1 }
   0x7   :  { %p1119_p2 = pnand %p1117_p1, %p1114_p0 }
   0x9   :  { %1122 = shalt.err (!%p1119_p2)
}
   0xa   :  { %s1123_s10 = scalar_lea.vmem %s32_s25, 6144  ;;  %p1128_p4 = scmp.lt.s32.totalorder %s32_s25, %s32_s25 }
   0xb   :  { %p1124_p3 = scmp.ne.s32.totalorder %s32_s25, %s1123_s10  ;;  %p1129_p5 = scmp.lt.s32.totalorder %s1123_s10, %s1123_s10 }
   0xd   :  { %p1130_p6 = por %p1129_p5, %p1128_p4 }
   0xf   :  { %p1131_p7 = pnand %p1130_p6, %p1124_p3 }
  0x11   :  { %1134 = shalt.err (!%p1131_p7)
}
  0x12   :  { %s1232_s11 = smov 64   ;;  %s1233_s12 = smov 4  }
  0x13   :  { %37 = dma.hbm_to_vmem [thread:$0]  %s1377_s1, 6144, %s32_s25, [#allocation6], %s1232_s11, %s1232_s11, %s1233_s12  }
  0x14   :  { %s1234_s15 = smov [#allocation2]   ;;  %s1235_s17 = smov [#allocation7]  }
  0x15   :  { %s22_s16 = sshll.u32 %s1234_s15, 4  ;;  %s45_s18 = sshll.u32 %s1235_s17, 4  ;;  %s23_s16 = int_to_ptr.vmem [resolvable:$true] %s22_s16  ;;  %s46_s18 = int_to_ptr.vmem [resolvable:$true] %s45_s18 }
  0x16   :  { %s1135_s21 = scalar_lea.hbm %s1376_s0, 768 }
  0x17   :  { %p1136_p8 = scmp.ne.s32.totalorder %s1376_s0, %s1135_s21  ;;  %p1139_p9 = scmp.lt.u32.totalorder %s1135_s21, %s1376_s0 }
  0x19   :  { %p1141_p10 = pnand %p1139_p9, %p1136_p8 }
  0x1b   :  { %1144 = shalt.err (!%p1141_p10)
}
  0x1c   :  { %s1145_s1 = scalar_lea.vmem %s23_s16, 768  ;;  %p1150_p12 = scmp.lt.s32.totalorder %s23_s16, %s23_s16 }
  0x1d   :  { %p1146_p11 = scmp.ne.s32.totalorder %s23_s16, %s1145_s1  ;;  %p1151_p13 = scmp.lt.s32.totalorder %s1145_s1, %s1145_s1 }
  0x1f   :  { %p1152_p0 = por %p1151_p13, %p1150_p12 }
  0x21   :  { %p1153_p1 = pnand %p1152_p0, %p1146_p11 }
  0x23   :  { %1156 = shalt.err (!%p1153_p1)
}
  0x24   :  { %25 = dma.hbm_to_vmem [thread:$0]  %s1376_s0, 768, %s23_s16, [#allocation3]  }
  0x25   :  { %s1157_s30 = scalar_lea.hbm %s1379_s3, 1024 }
  0x26   :  { %p1158_p2 = scmp.ne.s32.totalorder %s1379_s3, %s1157_s30  ;;  %p1161_p3 = scmp.lt.u32.totalorder %s1157_s30, %s1379_s3 }
  0x28   :  { %p1163_p4 = pnand %p1161_p3, %p1158_p2 }
  0x2a   :  { %1166 = shalt.err (!%p1163_p4)
}
  0x2b   :  { %s1167_s14 = scalar_lea.vmem %s46_s18, 1024  ;;  %p1172_p6 = scmp.lt.s32.totalorder %s46_s18, %s46_s18 }
  0x2c   :  { %p1168_p5 = scmp.ne.s32.totalorder %s46_s18, %s1167_s14  ;;  %p1173_p7 = scmp.lt.s32.totalorder %s1167_s14, %s1167_s14 }
  0x2e   :  { %p1174_p8 = por %p1173_p7, %p1172_p6 }
  0x30   :  { %p1175_p9 = pnand %p1174_p8, %p1168_p5 }
  0x32   :  { %1178 = shalt.err (!%p1175_p9)
}
  0x33   :  { %51 = dma.hbm_to_vmem [thread:$0]  %s1379_s3, 1024, %s46_s18, [#allocation6], %s1232_s11, %s1232_s11, %s1233_s12  }
  0x34   :  { %s1236_s16 = smov [#allocation8]   ;;  %s1179_s21 = scalar_lea.hbm %s1381_s5, 1024 }
  0x35   :  { %s59_s17 = sshll.u32 %s1236_s16, 4  ;;  %p1180_p10 = scmp.ne.s32.totalorder %s1381_s5, %s1179_s21  ;;  %s60_s17 = int_to_ptr.vmem [resolvable:$true] %s59_s17 }
  0x36   :  { %p1183_p11 = scmp.lt.u32.totalorder %s1179_s21, %s1381_s5 }
  0x38   :  { %p1185_p12 = pnand %p1183_p11, %p1180_p10 }
  0x3a   :  { %1188 = shalt.err (!%p1185_p12)
}
  0x3b   :  { %s1189_s1 = scalar_lea.vmem %s60_s17, 1024  ;;  %p1194_p0 = scmp.lt.s32.totalorder %s60_s17, %s60_s17 }
  0x3c   :  { %p1190_p13 = scmp.ne.s32.totalorder %s60_s17, %s1189_s1  ;;  %p1195_p1 = scmp.lt.s32.totalorder %s1189_s1, %s1189_s1 }
  0x3e   :  { %p1196_p2 = por %p1195_p1, %p1194_p0 }
  0x40   :  { %p1197_p3 = pnand %p1196_p2, %p1190_p13 }
  0x42   :  { %1200 = shalt.err (!%p1197_p3)
}
  0x43   :  { %65 = dma.hbm_to_vmem [thread:$0]  %s1381_s5, 1024, %s60_s17, [#allocation9], %s1232_s11, %s1232_s11, %s1233_s12  }
  0x44   :  { %1223 = dma.done.wait [#allocation3], 768  }
  0x45   :  { %1224 = vsyncadd [#allocation3], 4294966528 }
  0x46   :  { %1225 = dma.done.wait [#allocation6], 7168  }
  0x47   :  { %1226 = vsyncadd [#allocation6], 4294960128 }
  0x48   :  { %1227 = dma.done.wait [#allocation9], 1024  }
  0x49   :  { %1228 = vsyncadd [#allocation9], 4294966272  ;;  %v1049_v0 = vld [vmem:[#allocation5 + $0x40] sm:$0xff]   ;;  %v1053_v4 = vld [vmem:[#allocation5 + $0x48] sm:$0xff]   ;;  %v1237_v61 = vmov 0.0   ;;  %vm1238_vm0 = vmmov 0  }
  0x4a   :  { %v1050_v1 = vld [vmem:[#allocation5] sm:$0xff]   ;;  %916 = vmatprep.subr.bf16.mxu0 %v1049_v0  ;;  %v1054_v5 = vld [vmem:[#allocation5 + $0x8] sm:$0xff]   ;;  %v1057_v8 = vld [vmem:[#allocation5 + $0x50] sm:$0xff]   ;;  %s1239_s28 = smov [#allocation10]  }
  0x4b   :  { %v1051_v2 = vld [vmem:[#allocation5 + $0xc0] sm:$0xff]   ;;  %917 = vmatpush3.bf16.msra.mxu0 %v1050_v1  ;;  %v1055_v6 = vld [vmem:[#allocation5 + $0xc8] sm:$0xff]   ;;  %v1058_v9 = vld [vmem:[#allocation5 + $0x10] sm:$0xff]   ;;  %s838_s29 = sshll.u32 %s1239_s28, 4  ;;  %s839_s29 = int_to_ptr.vmem [resolvable:$true] %s838_s29 }
  0x4c   :  { %v1052_v3 = vld [vmem:[#allocation5 + $0x80] sm:$0xff]   ;;  %938 = vmatprep.subr.bf16.mxu1 %v1051_v2  ;;  %918 = vmatprep.subr.bf16.mxu0 %v1053_v4  ;;  %v1056_v7 = vld [vmem:[#allocation5 + $0x88] sm:$0xff]   ;;  %v1059_v10 = vld [vmem:[#allocation5 + $0xd0] sm:$0xff]   ;;  %p1206_p5 = scmp.lt.s32.totalorder %s839_s29, %s839_s29 }
  0x4d   :  { %939 = vmatpush3.bf16.msra.mxu1 %v1052_v3  ;;  %v1060_v11 = vld [vmem:[#allocation5 + $0x90] sm:$0xff]   ;;  %v1061_v12 = vld [vmem:[#allocation5 + $0x58] sm:$0xff]   ;;  %v1065_v16 = vld [vmem:[#allocation5 + $0x60] sm:$0xff]  }
  0x4e   :  { %940 = vmatprep.subr.bf16.mxu1 %v1055_v6  ;;  %v1062_v13 = vld [vmem:[#allocation5 + $0x18] sm:$0xff]   ;;  %v1066_v17 = vld [vmem:[#allocation5 + $0x20] sm:$0xff]   ;;  %v1069_v20 = vld [vmem:[#allocation5 + $0x68] sm:$0xff]  }
  0x4f   :  { %919 = vmatpush3.bf16.msra.mxu0 %v1054_v5  ;;  %v1063_v14 = vld [vmem:[#allocation5 + $0xd8] sm:$0xff]   ;;  %v1067_v18 = vld [vmem:[#allocation5 + $0xe0] sm:$0xff]   ;;  %v1070_v21 = vld [vmem:[#allocation5 + $0x28] sm:$0xff]  }
  0x50   :  { %920 = vmatprep.subr.bf16.mxu0 %v1057_v8  ;;  %v1064_v15 = vld [vmem:[#allocation5 + $0x98] sm:$0xff]   ;;  %v1068_v19 = vld [vmem:[#allocation5 + $0xa0] sm:$0xff]   ;;  %v1071_v22 = vld [vmem:[#allocation5 + $0xe8] sm:$0xff]  }
  0x51   :  { %941 = vmatpush3.bf16.msra.mxu1 %v1056_v7  ;;  %v1072_v23 = vld [vmem:[#allocation5 + $0xa8] sm:$0xff]   ;;  %v1073_v24 = vld [vmem:[#allocation5 + $0x70] sm:$0xff]   ;;  %v1077_v28 = vld [vmem:[#allocation5 + $0x78] sm:$0xff]  }
  0x52   :  { %942 = vmatprep.subr.bf16.mxu1 %v1059_v10  ;;  %v1074_v25 = vld [vmem:[#allocation5 + $0x30] sm:$0xff]   ;;  %v1078_v29 = vld [vmem:[#allocation5 + $0x38] sm:$0xff]   ;;  %v1081_v36 = vld [vmem:[#allocation5 + $0x140] sm:$0xff]  }
  0x53   :  { %921 = vmatpush3.bf16.msra.mxu0 %v1058_v9  ;;  %v1075_v26 = vld [vmem:[#allocation5 + $0xf0] sm:$0xff]   ;;  %v1079_v30 = vld [vmem:[#allocation5 + $0xf8] sm:$0xff]   ;;  %v84_v37 = vld [vmem:[#allocation2 + $0x18] sm:$0xff] }
  0x54   :  { %922 = vmatprep.subr.bf16.mxu0 %v1061_v12  ;;  %v1076_v27 = vld [vmem:[#allocation5 + $0xb0] sm:$0xff]   ;;  %v82_v31 = vld [vmem:[#allocation2 + $0x8] sm:$0xff]  ;;  %v90_v38 = vpack.c.bf16 %v84_v37, %v84_v37  ;;  %v1082_v39 = vld [vmem:[#allocation5 + $0x100] sm:$0xff]  }
  0x55   :  { %943 = vmatpush3.bf16.msra.mxu1 %v1060_v11  ;;  %v88_v32 = vpack.c.bf16 %v82_v31, %v82_v31  ;;  %v1080_v33 = vld [vmem:[#allocation5 + $0xb8] sm:$0xff]   ;;  %v81_v34 = vld [vmem:[#allocation2] sm:$0xff]  ;;  %v83_v40 = vld [vmem:[#allocation2 + $0x10] sm:$0xff] }
  0x56   :  { %944 = vmatprep.subr.bf16.mxu1 %v1063_v14  ;;  %v87_v35 = vpack.c.bf16 %v81_v34, %v81_v34  ;;  %556 = vmatprep.mubr.bf16.mxu1 %v90_v38  ;;  %v89_v41 = vpack.c.bf16 %v83_v40, %v83_v40  ;;  %v1083_v42 = vld [vmem:[#allocation5 + $0x148] sm:$0xff]   ;;  %v1085_v44 = vld [vmem:[#allocation5 + $0x150] sm:$0xff]   ;;  %v1087_v46 = vld [vmem:[#allocation5 + $0x158] sm:$0xff]  }
  0x57   :  { %923 = vmatpush3.bf16.msra.mxu0 %v1062_v13  ;;  %516 = vmatprep.mubr.bf16.mxu0 %v88_v32  ;;  %v1084_v43 = vld [vmem:[#allocation5 + $0x108] sm:$0xff]   ;;  %v1086_v45 = vld [vmem:[#allocation5 + $0x110] sm:$0xff]   ;;  %v1088_v47 = vld [vmem:[#allocation5 + $0x118] sm:$0xff]  }
  0x58   :  { %924 = vmatprep.subr.bf16.mxu0 %v1065_v16  ;;  %v1089_v48 = vld [vmem:[#allocation5 + $0x160] sm:$0xff]   ;;  %v1091_v50 = vld [vmem:[#allocation5 + $0x168] sm:$0xff]   ;;  %v86_v51 = vld [vmem:[#allocation2 + $0x28] sm:$0xff] }
  0x59   :  { %945 = vmatpush3.bf16.msra.mxu1 %v1064_v15  ;;  %v1090_v49 = vld [vmem:[#allocation5 + $0x120] sm:$0xff]   ;;  %v1092_v52 = vld [vmem:[#allocation5 + $0x128] sm:$0xff]   ;;  %v92_v53 = vpack.c.bf16 %v86_v51, %v86_v51  ;;  %v1093_v54 = vld [vmem:[#allocation5 + $0x170] sm:$0xff]  }
  0x5a   :  { %946 = vmatprep.subr.bf16.mxu1 %v1067_v18  ;;  %v1094_v55 = vld [vmem:[#allocation5 + $0x130] sm:$0xff]   ;;  %v1095_v56 = vld [vmem:[#allocation5 + $0x178] sm:$0xff]   ;;  %v1097_v60 = vld [vmem:[#allocation7] sm:$0xff]  }
  0x5b   :  { %925 = vmatpush3.bf16.msra.mxu0 %v1066_v17  ;;  %v1096_v57 = vld [vmem:[#allocation5 + $0x138] sm:$0xff]   ;;  %v85_v58 = vld [vmem:[#allocation2 + $0x20] sm:$0xff]  ;;  %v1098_v62 = vld [vmem:[#allocation7 + $0x8] sm:$0xff]  }
  0x5c   :  { %926 = vmatprep.subr.bf16.mxu0 %v1069_v20  ;;  %v91_v59 = vpack.c.bf16 %v85_v58, %v85_v58  ;;  %v1099_v63 = vld [vmem:[#allocation7 + $0x10] sm:$0xff]   ;;  %v1100_v0 = vld [vmem:[#allocation7 + $0x18] sm:$0xff]   ;;  %v1101_v1 = vld [vmem:[#allocation7 + $0x20] sm:$0xff]  }
  0x5d   :  { %947 = vmatpush3.bf16.msra.mxu1 %v1068_v19  ;;  %v1102_v2 = vld [vmem:[#allocation7 + $0x28] sm:$0xff]   ;;  %v1103_v3 = vld [vmem:[#allocation7 + $0x30] sm:$0xff]   ;;  %v1104_v4 = vld [vmem:[#allocation7 + $0x38] sm:$0xff]  }
  0x5e   :  { %948 = vmatprep.subr.bf16.mxu1 %v1071_v22  ;;  %v1105_v5 = vld [vmem:[#allocation8] sm:$0xff]   ;;  %v1106_v6 = vld [vmem:[#allocation8 + $0x8] sm:$0xff]   ;;  %v1107_v7 = vld [vmem:[#allocation8 + $0x10] sm:$0xff]  }
  0x5f   :  { %927 = vmatpush3.bf16.msra.mxu0 %v1070_v21  ;;  %v1108_v8 = vld [vmem:[#allocation8 + $0x18] sm:$0xff]   ;;  %v1109_v9 = vld [vmem:[#allocation8 + $0x20] sm:$0xff]   ;;  %v1110_v10 = vld [vmem:[#allocation8 + $0x28] sm:$0xff]  }
  0x60   :  { %928 = vmatprep.subr.bf16.mxu0 %v1073_v24  ;;  %v849_v12 = vld [vmem:[%s1378_s2] ss:$0 sm:$0xff] }
  0x61   :  { %949 = vmatpush3.bf16.msra.mxu1 %v1072_v23  ;;  %v1111_v32 = vld [vmem:[#allocation8 + $0x30] sm:$0xff]  }
  0x62   :  { %950 = vmatprep.subr.bf16.mxu1 %v1075_v26  ;;  %v898_v34 = vld [vmem:[%s1380_s4] ss:$0 sm:$0xff]  ;;  %s1201_s4 = scalar_lea.vmem %s839_s29, 64 }
  0x63   :  { %929 = vmatpush3.bf16.msra.mxu0 %v1074_v25  ;;  %p1202_p4 = scmp.ne.s32.totalorder %s839_s29, %s1201_s4  ;;  %p1207_p6 = scmp.lt.s32.totalorder %s1201_s4, %s1201_s4 }
  0x64   :  { %930 = vmatprep.subr.bf16.mxu0 %v1077_v28 }
  0x65   :  { %951 = vmatpush3.bf16.msra.mxu1 %v1076_v27  ;;  %p1208_p7 = por %p1207_p6, %p1206_p5 }
  0x66   :  { %952 = vmatprep.subr.bf16.mxu1 %v1079_v30 }
  0x67   :  { %931 = vmatpush3.bf16.msra.mxu0 %v1078_v29  ;;  %p1209_p8 = pnand %p1208_p7, %p1202_p4 }
  0x68   :  { %960 = vmatprep.subr.bf16.mxu0 %v1081_v36 }
  0x69   :  { %953 = vmatpush3.bf16.msra.mxu1 %v1080_v33  ;;  %v1112_v33 = vld [vmem:[#allocation8 + $0x38] sm:$0xff]  }
  0x6a   :  { %517 = vmatmul.mubr.bf16.vlgmr.msra.gmra.mrb[0].mxu0 %v87_v35  ;;  %1000 = vmatprep.subr.bf16.mxu1 %v1237_v61 }
  0x6b   :  { %961 = vmatpush3.bf16.msra.mxu0 %v1082_v39  ;;  %596 = vmatprep.mubr.bf16.mxu0 %v92_v53 }
  0x6c   :  { %557 = vmatmul.mubr.bf16.vlgmr.msra.gmra.mrb[0].mxu1 %v89_v41  ;;  %962 = vmatprep.subr.bf16.mxu0 %v1083_v42  ;;  %v907_v42 = vld [vmem:[%s1382_s6] ss:$0 sm:$0xff] }
  0x6d   :  { %1001 = vmatpush3.bf16.msra.mxu1 %v1097_v60  ;;  %1016 = vmatprep.mubr.msk.bf16.mxu1 %vm1238_vm0, %v1237_v61 }
  0x6e   :  { %1002 = vmatprep.subr.bf16.mxu1 %v1237_v61 }
  0x6f   :  { %963 = vmatpush3.bf16.msra.mxu0 %v1084_v43 }
  0x70   :  { %964 = vmatprep.subr.bf16.mxu0 %v1085_v44 }
  0x71   :  { %1003 = vmatpush3.bf16.msra.mxu1 %v1098_v62 }
  0x72   :  { %1004 = vmatprep.subr.bf16.mxu1 %v1237_v61 }
  0x73   :  { %965 = vmatpush3.bf16.msra.mxu0 %v1086_v45 }
  0x74   :  { %966 = vmatprep.subr.bf16.mxu0 %v1087_v46 }
  0x75   :  { %1005 = vmatpush3.bf16.msra.mxu1 %v1099_v63 }
  0x76   :  { %1006 = vmatprep.subr.bf16.mxu1 %v1237_v61 }
  0x77   :  { %967 = vmatpush3.bf16.msra.mxu0 %v1088_v47 }
  0x78   :  { %968 = vmatprep.subr.bf16.mxu0 %v1089_v48 }
  0x79   :  { %1007 = vmatpush3.bf16.msra.mxu1 %v1100_v0 }
  0x7a   :  { %1008 = vmatprep.subr.bf16.mxu1 %v1237_v61 }
  0x7b   :  { %969 = vmatpush3.bf16.msra.mxu0 %v1090_v49 }
  0x7c   :  { %970 = vmatprep.subr.bf16.mxu0 %v1091_v50 }
  0x7d   :  { %1009 = vmatpush3.bf16.msra.mxu1 %v1101_v1 }
  0x7e   :  { %1010 = vmatprep.subr.bf16.mxu1 %v1237_v61 }
  0x7f   :  { %971 = vmatpush3.bf16.msra.mxu0 %v1092_v52 }
  0x80   :  { %972 = vmatprep.subr.bf16.mxu0 %v1093_v54 }
  0x81   :  { %1011 = vmatpush3.bf16.msra.mxu1 %v1102_v2 }
  0x82   :  { %1012 = vmatprep.subr.bf16.mxu1 %v1237_v61 }
  0x83   :  { %973 = vmatpush3.bf16.msra.mxu0 %v1094_v55 }
  0x84   :  { %974 = vmatprep.subr.bf16.mxu0 %v1095_v56 }
  0x85   :  { %1013 = vmatpush3.bf16.msra.mxu1 %v1103_v3 }
  0x86   :  { %1014 = vmatprep.subr.bf16.mxu1 %v1237_v61 }
  0x87   :  { %975 = vmatpush3.bf16.msra.mxu0 %v1096_v57 }
  0x88   :  { %1020 = vmatprep.subr.bf16.mxu0 %v1237_v61 }
  0x89   :  { %1015 = vmatpush3.bf16.msra.mxu1 %v1104_v4 }
  0x8a   :  { %597 = vmatmul.mubr.bf16.vlgmr.msra.gmra.mrb[4].mxu0 %v91_v59 }
  0x8b   :  { %1036 = vmatprep.mubr.msk.bf16.mxu0 %vm1238_vm0, %v1237_v61  ;;  %1021 = vmatpush3.bf16.msra.mxu0 %v1105_v5 }
  0x8c   :  { %1022 = vmatprep.subr.bf16.mxu0 %v1237_v61 }
  0x8f   :  { %1023 = vmatpush3.bf16.msra.mxu0 %v1106_v6 }
  0x90   :  { %1024 = vmatprep.subr.bf16.mxu0 %v1237_v61 }
  0x93   :  { %1025 = vmatpush3.bf16.msra.mxu0 %v1107_v7 }
  0x94   :  { %1026 = vmatprep.subr.bf16.mxu0 %v1237_v61 }
  0x97   :  { %1027 = vmatpush3.bf16.msra.mxu0 %v1108_v8 }
  0x98   :  { %1028 = vmatprep.subr.bf16.mxu0 %v1237_v61 }
  0x9b   :  { %1029 = vmatpush3.bf16.msra.mxu0 %v1109_v9 }
  0x9c   :  { %1030 = vmatprep.subr.bf16.mxu0 %v1237_v61 }
  0x9f   :  { %1031 = vmatpush3.bf16.msra.mxu0 %v1110_v10 }
  0xa0   :  { %1032 = vmatprep.subr.bf16.mxu0 %v1237_v61 }
  0xa3   :  { %1033 = vmatpush3.bf16.msra.mxu0 %v1111_v32 }
  0xa4   :  { %1034 = vmatprep.subr.bf16.mxu0 %v1237_v61 }
  0xa7   :  { %1035 = vmatpush3.bf16.msra.mxu0 %v1112_v33 }
 0x13d   :  { %v932_v11 = vpop.f32.mrb[0].mxu0 }
 0x13e   :  { %v933_v13 = vpop.f32.mrb[1].mxu0 }
 0x13f   :  { %v934_v14 = vadd.f32 %v933_v13, %v932_v11  ;;  %v935_v15 = vpop.f32.mrb[2].mxu0  ;;  %v954_v16 = vpop.f32.mrb[0].mxu1 }
 0x140   :  { %v936_v17 = vpop.f32.mrb[3].mxu0  ;;  %v955_v19 = vpop.f32.mrb[1].mxu1 }
 0x141   :  { %v519_v18 = vadd.f32 %v934_v14, %v849_v12  ;;  %v956_v20 = vadd.f32 %v955_v19, %v954_v16  ;;  %v957_v21 = vpop.f32.mrb[2].mxu1 }
 0x142   :  { %v958_v22 = vpop.f32.mrb[3].mxu1 }
 0x143   :  { %v559_v23 = vadd.f32 %v956_v20, %v519_v18 }
 0x15d   :  { %v976_v24 = vpop.f32.mrb[4].mxu0 }
 0x15e   :  { %v977_v25 = vpop.f32.mrb[5].mxu0 }
 0x15f   :  { %v978_v26 = vadd.f32 %v977_v25, %v976_v24  ;;  %v979_v27 = vpop.f32.mrb[6].mxu0 }
 0x160   :  { %v980_v28 = vpop.f32.mrb[7].mxu0 }
 0x161   :  { %v599_v29 = vadd.f32 %v978_v26, %v559_v23 }
 0x163   :  { %v604_v30 = vmax.f32 %v599_v29, 0.0 }
 0x165   :  { %v605_v31 = vpack.c.bf16 %v604_v30, %v604_v30 }
 0x167   :  { %1017 = vmatmul.mubr.bf16.vlgmr.msra.gmra.mrb[4].mxu1 %v605_v31 }
 0x23a   :  { %v711_v35 = vpop.f32.mrb[4].mxu1 }
 0x23b   :  { %v712_v36 = vadd.f32 %v898_v34, %v711_v35  ;;  %v1018_v37 = vpop.f32.mrb[5].mxu1 }
 0x23c   :  { %v714_v38 = vpop.f32.mrb[6].mxu1 }
 0x23d   :  { %v717_v39 = vmax.f32 %v712_v36, 0.0  ;;  %v1019_v40 = vpop.f32.mrb[7].mxu1 }
 0x23f   :  { %v718_v41 = vpack.c.bf16 %v717_v39, %v717_v39 }
 0x241   :  { %1037 = vmatmul.mubr.bf16.vlgmr.msra.gmra.mrb[8].mxu0 %v718_v41 }
 0x314   :  { %v824_v43 = vpop.f32.mrb[8].mxu0 }
 0x315   :  { %v825_v44 = vadd.f32 %v907_v42, %v824_v43  ;;  %v1038_v45 = vpop.f32.mrb[9].mxu0 }
 0x316   :  { %v827_v46 = vpop.f32.mrb[10].mxu0 }
 0x317   :  { %v830_v47 = vpack.c.bf16 %v825_v44, %v825_v44  ;;  %v1039_v48 = vpop.f32.mrb[11].mxu0 }
 0x319   :  { %831 = vst [vmem:[#allocation10] sm:$0xf] %v830_v47 }
 0x31a   :  { %1212 = shalt.err (!%p1209_p8)
}
 0x31b   :  { %s1213_s6 = scalar_lea.hbm %s1383_s7, 64 }
 0x31c   :  { %p1214_p9 = scmp.ne.s32.totalorder %s1383_s7, %s1213_s6  ;;  %p1217_p10 = scmp.lt.u32.totalorder %s1213_s6, %s1383_s7 }
 0x31e   :  { %p1219_p11 = pnand %p1217_p10, %p1214_p9 }
 0x320   :  { %1222 = shalt.err (!%p1219_p11)
}
 0x321   :  { %841 = dma.vmem_to_hbm [thread:$0]  %s839_s29, 64, %s1383_s7, [#allocation4]  }
 0x322   :  { %1229 = dma.done.wait [#allocation4], 64  }
 0x323   :  { %1230 = vsyncadd [#allocation4], 4294967232 }
 0x324   :  { %845 = vsyncpa [#allocation3], 1 }
 0x325   :  { %846 = vsyncpa [#allocation6], 1 }
 0x326   :  { %847 = vsyncpa [#allocation9], 1 }
 0x327   :  { %848 = vsyncpa [#allocation4], 1 }

</bundles_post_ra>
